<compile_context>
chip_gen: v7x
topology: tpu7x:2x2x1
jax: 0.10.0
libtpu: 0.0.40
codegen_flags: <defaults>
</compile_context>

<pallas_src>
import functools

import jax
import jax.numpy as jnp
from jax.experimental import pallas as pl
from jax.experimental.pallas import tpu as pltpu

NUM_TAGS = 14

_STATS_LIST = [
    0.10309489832322512, 0.024759186585800928, 0.0416250445950767,
    0.020540492329646807, 0.11877452729218695, 0.022440242597217268,
    0.015037459864430967, 0.0020246164823403494, 0.17743489118801284,
    0.05156974669996432, 0.05646628612201213, 0.030190866928291118,
    0.012763110952550838, 0.04728861933642526,
]

STATS = jnp.array(_STATS_LIST, dtype=jnp.float32)

_LANE_WIDTH = 896       # lcm(14, 128): lane-dense and class-periodic per row
_ROW_TILE_MAX = 1024    # 1024 x 896 f32 = 3.5 MiB per input per pipeline buffer
_NUM_PARALLEL = 2       # v7x has 2 TensorCores per chip; harmless on v5e/v6e


def _cdiv(a, b):
    return (a + b - 1) // b


def _nih_loss_kernel(stats_ref, pred_ref, target_ref, out_ref, acc_ref, *,
                     tm, m_rows, grid_j, nb_full, needs_mask, scale):
    """One (tm, 896) lane-dense tile of the flattened [B*14] stream."""
    p = pl.program_id(0)   # parallel slot (TensorCore)
    j = pl.program_id(1)   # reduction step within the slot

    @pl.when(j == 0)
    def _init():
        acc_ref[...] = jnp.zeros_like(acc_ref)

    pred = pred_ref[...].astype(jnp.float32)      # (tm, 896)
    tgt = target_ref[...].astype(jnp.float32)     # (tm, 896)
    stats = stats_ref[...]                        # (1, 896): stats[lane % 14]

    # PyTorch F.binary_cross_entropy clamps log terms at -100.
    log_p = jnp.maximum(jnp.log(pred), -100.0)
    log_1mp = jnp.maximum(jnp.log(1.0 - pred), -100.0)
    # inner == -BCE; the minus sign is folded into `scale` at finalize.
    inner = tgt * (log_p - log_1mp) + log_1mp
    weight = jnp.abs(tgt - stats)
    prod = weight * inner                         # (tm, 896) == -weight*BCE

    def _accumulate(x):
        if tm > 8:
            # Layout-free regroup of sublane rows, then vreg-wise adds only.
            acc_ref[...] += jnp.sum(x.reshape(tm // 8, 8, x.shape[-1]), axis=0)
        else:
            acc_ref[...] += x

    if not needs_mask:
        _accumulate(prod)
    else:
        b = p * grid_j + j   # global (unclamped) row-block index

        @pl.when(b < nb_full)
        def _full_block():
            _accumulate(prod)

        @pl.when(b >= nb_full)
        def _ragged_or_duplicate_block():
            # select (not multiply): OOB rows may hold garbage / NaN.
            rows = jax.lax.broadcasted_iota(jnp.int32, prod.shape, 0)
            valid = (b * tm + rows) < m_rows
            _accumulate(jnp.where(valid, prod, 0.0))

    @pl.when(j == pl.num_programs(1) - 1)
    def _finalize():
        # Single cross-lane/sublane reduce + scale, once per parallel slot.
        out_ref[...] = jnp.broadcast_to(jnp.sum(acc_ref[...]) * scale, (1, 128))


def nih_loss(pred, target, *, row_tile=_ROW_TILE_MAX, num_parallel=_NUM_PARALLEL):
    """pred, target: [B, 14] float arrays (f32 or bf16). Returns scalar f32 loss."""
    assert pred.shape == target.shape
    batch, ntags = pred.shape
    assert ntags == NUM_TAGS

    total = batch * NUM_TAGS
    lane = _LANE_WIDTH
    m_rows = max(_cdiv(total, lane), 1)
    padded_total = m_rows * lane

    # Row-major [B,14] is contiguous -> flat view is free; the [M,896] reshape is
    # metadata-only whenever B % 64 == 0.
    pred_flat = pred.reshape(total)
    target_flat = target.reshape(total)
    if padded_total != total:
        # Only when B % 64 != 0: pad the < 896-element tail with pred=target=1,
        # which gives BCE(1,1) == 0 exactly under the clamped-log formulation.
        pad = padded_total - total
        pred_flat = jnp.pad(pred_flat, (0, pad), constant_values=1.0)
        target_flat = jnp.pad(target_flat, (0, pad), constant_values=1.0)

    pred2 = pred_flat.reshape(m_rows, lane)
    target2 = target_flat.reshape(m_rows, lane)

    # Sublane tile: multiple of 8 (or the full row count when tiny).
    if m_rows < 8:
        tm = m_rows
    else:
        tm = min(row_tile, (m_rows // 8) * 8)

    nb = _cdiv(m_rows, tm)                 # real row-blocks (last may be ragged)
    grid_j = _cdiv(nb, num_parallel)       # reduction steps per parallel slot
    nb_full = m_rows // tm                 # row-blocks with no OOB rows
    needs_mask = (num_parallel * grid_j * tm != m_rows)

    # Per-class stats as a lane-periodic row: class == flat_index % 14 == lane % 14.
    stats_row = jnp.tile(STATS, lane // NUM_TAGS).reshape(1, lane)

    # Kernel accumulates -weight*BCE; fold the sign and the mean normalization here.
    scale = -1.0 / float(batch * NUM_TAGS)

    acc_rows = 8 if tm >= 8 else tm

    kernel = functools.partial(
        _nih_loss_kernel, tm=tm, m_rows=m_rows, grid_j=grid_j,
        nb_full=nb_full, needs_mask=needs_mask, scale=scale)

    def _in_map(p, j):
        # Clamp keeps every DMA in bounds; overrun blocks are masked to zero
        # contribution inside the kernel using the unclamped index.
        return (jnp.minimum(p * grid_j + j, nb - 1), 0)

    out = pl.pallas_call(
        kernel,
        out_shape=jax.ShapeDtypeStruct((1, num_parallel * 128), jnp.float32),
        grid=(num_parallel, grid_j),
        in_specs=[
            pl.BlockSpec((1, lane), lambda p, j: (0, 0)),   # stats (resident)
            pl.BlockSpec((tm, lane), _in_map),              # pred tiles
            pl.BlockSpec((tm, lane), _in_map),              # target tiles
        ],
        # One lane-dense 128-wide output row per parallel slot.
        out_specs=pl.BlockSpec((1, 128), lambda p, j: (0, p)),
        scratch_shapes=[pltpu.VMEM((acc_rows, lane), jnp.float32)],
        compiler_params=pltpu.CompilerParams(
            dimension_semantics=("parallel", "arbitrary"),
            vmem_limit_bytes=32 * 1024 * 1024),
    )(stats_row, pred2, target2)

    partials = out.reshape(num_parallel, 128)[:, 0]
    return jnp.sum(partials)


def nih_loss_ref(pred, target):
    """Pure-JAX reference matching the PyTorch forward."""
    pred = pred.astype(jnp.float32)
    target = target.astype(jnp.float32)
    stats = jnp.broadcast_to(STATS, target.shape)
    weight = jnp.abs(target - stats)
    log_p = jnp.maximum(jnp.log(pred), -100.0)
    log_1mp = jnp.maximum(jnp.log(1.0 - pred), -100.0)
    bce = -(target * log_p + (1.0 - target) * log_1mp)
    per_class = jnp.mean(weight * bce, axis=0) / NUM_TAGS
    return jnp.sum(per_class)


if __name__ == "__main__":
    key = jax.random.PRNGKey(0)

    def _make_inputs(k, batch):
        k1, k2 = jax.random.split(k)
        pred = jax.nn.sigmoid(jax.random.normal(k1, (batch, NUM_TAGS), jnp.float32))
        target = (jax.random.uniform(k2, (batch, NUM_TAGS)) > 0.5).astype(jnp.float32)
        return pred, target

    # Required tiny case (batch=2) plus two extra shapes that exercise the
    # no-pad path (batch % 64 == 0) and the tm>8 reshape-accumulate path.
    for i, batch in enumerate((2, 64, 1024)):
        sub = jax.random.fold_in(key, i)
        pred, target = _make_inputs(sub, batch)
        loss = nih_loss(pred, target)
        jax.block_until_ready(loss)
        ref = nih_loss_ref(pred, target)
        assert jnp.allclose(loss, ref, rtol=1e-4, atol=1e-6), (batch, loss, ref)

    print("KERNEL_OK")
</pallas_src>

<mosaic_0001>
module attributes {stable_mosaic.version = 11 : i64} {
  func.func @_nih_loss_kernel(%arg0: i32, %arg1: i32, %arg2: memref<1x896xf32, #tpu.memory_space<vmem>>, %arg3: memref<1x896xf32, #tpu.memory_space<vmem>>, %arg4: memref<1x896xf32, #tpu.memory_space<vmem>>, %arg5: memref<1x128xf32, #tpu.memory_space<vmem>>, %arg6: memref<1x896xf32, #tpu.memory_space<vmem>>) attributes {dimension_semantics = [#tpu.dimension_semantics<parallel>, #tpu.dimension_semantics<arbitrary>], iteration_bounds = array<i64: 2, 1>, scalar_prefetch = 0 : i64, scratch_operands = 1 : i64, tpu.core_type = #tpu.core_type<tc>, window_params = [{pipeline_mode = #tpu.pipeline_mode<synchronous>, transform_indices = @transform_0, window_bounds = array<i64: 1, 896>}, {transform_indices = @transform_1, window_bounds = array<i64: 1, 896>}, {transform_indices = @transform_2, window_bounds = array<i64: 1, 896>}, {transform_indices = @transform_3, window_bounds = array<i64: 1, 128>}]} {
    %c0_i32 = arith.constant 0 : i32
    %0 = arith.cmpi eq, %arg1, %c0_i32 : i32
    %1 = arith.extui %0 : i1 to i32
    %c0_i32_0 = arith.constant 0 : i32
    %2 = arith.cmpi ne, %1, %c0_i32_0 : i32
    scf.if %2 {
      %cst_14 = arith.constant 0.000000e+00 : f32
      %31 = vector.broadcast %cst_14 : f32 to vector<1x896xf32>
      %c0_15 = arith.constant 0 : index
      %c0_16 = arith.constant 0 : index
      %32 = vector.load %arg6[%c0_15, %c0_16] : memref<1x896xf32, #tpu.memory_space<vmem>>, vector<1x896xf32>
      tpu.vector_store %arg6[%c0_15, %c0_16], %31 {strides = array<i32>} : memref<1x896xf32, #tpu.memory_space<vmem>>, vector<1x896xf32>,
    } else {
    }
    %c0 = arith.constant 0 : index
    %c0_1 = arith.constant 0 : index
    %3 = vector.load %arg3[%c0, %c0_1] : memref<1x896xf32, #tpu.memory_space<vmem>>, vector<1x896xf32>
    %c0_2 = arith.constant 0 : index
    %c0_3 = arith.constant 0 : index
    %4 = vector.load %arg4[%c0_2, %c0_3] : memref<1x896xf32, #tpu.memory_space<vmem>>, vector<1x896xf32>
    %c0_4 = arith.constant 0 : index
    %c0_5 = arith.constant 0 : index
    %5 = vector.load %arg2[%c0_4, %c0_5] : memref<1x896xf32, #tpu.memory_space<vmem>>, vector<1x896xf32>
    %6 = math.log %3 : vector<1x896xf32>
    %cst = arith.constant -1.000000e+02 : f32
    %7 = vector.broadcast %cst : f32 to vector<1x896xf32>
    %8 = arith.maximumf %6, %7 : vector<1x896xf32>
    %cst_6 = arith.constant 1.000000e+00 : f32
    %9 = vector.broadcast %cst_6 : f32 to vector<1x896xf32>
    %10 = arith.subf %9, %3 : vector<1x896xf32>
    %11 = math.log %10 : vector<1x896xf32>
    %cst_7 = arith.constant -1.000000e+02 : f32
    %12 = vector.broadcast %cst_7 : f32 to vector<1x896xf32>
    %13 = arith.maximumf %11, %12 : vector<1x896xf32>
    %14 = arith.subf %8, %13 : vector<1x896xf32>
    %15 = arith.mulf %4, %14 : vector<1x896xf32>
    %16 = arith.addf %15, %13 : vector<1x896xf32>
    %17 = arith.subf %4, %5 : vector<1x896xf32>
    %18 = math.absf %17 : vector<1x896xf32>
    %19 = arith.mulf %18, %16 : vector<1x896xf32>
    %c1_i32 = arith.constant 1 : i32
    %20 = arith.muli %arg0, %c1_i32 : i32
    %21 = arith.addi %20, %arg1 : i32
    %c1_i32_8 = arith.constant 1 : i32
    %22 = arith.cmpi slt, %21, %c1_i32_8 : i32
    %23 = arith.extui %22 : i1 to i32
    %c0_i32_9 = arith.constant 0 : i32
    %24 = arith.cmpi ne, %23, %c0_i32_9 : i32
    scf.if %24 {
      %c0_14 = arith.constant 0 : index
      %c0_15 = arith.constant 0 : index
      %31 = vector.load %arg6[%c0_14, %c0_15] : memref<1x896xf32, #tpu.memory_space<vmem>>, vector<1x896xf32>
      %32 = arith.addf %31, %19 : vector<1x896xf32>
      %c0_16 = arith.constant 0 : index
      %c0_17 = arith.constant 0 : index
      %33 = vector.load %arg6[%c0_16, %c0_17] : memref<1x896xf32, #tpu.memory_space<vmem>>, vector<1x896xf32>
      tpu.vector_store %arg6[%c0_16, %c0_17], %32 {strides = array<i32>} : memref<1x896xf32, #tpu.memory_space<vmem>>, vector<1x896xf32>,
    } else {
    }
    %c1_i32_10 = arith.constant 1 : i32
    %25 = arith.cmpi sge, %21, %c1_i32_10 : i32
    %26 = arith.extui %25 : i1 to i32
    %c0_i32_11 = arith.constant 0 : i32
    %27 = arith.cmpi ne, %26, %c0_i32_11 : i32
    scf.if %27 {
      %31 = tpu.iota {dimensions = array<i32: 0>} : vector<1x896xi32>
      %c1_i32_14 = arith.constant 1 : i32
      %32 = arith.muli %21, %c1_i32_14 : i32
      %33 = vector.broadcast %32 : i32 to vector<1x896xi32>
      %34 = arith.addi %33, %31 : vector<1x896xi32>
      %c1_i32_15 = arith.constant 1 : i32
      %35 = vector.broadcast %c1_i32_15 : i32 to vector<1x896xi32>
      %36 = arith.cmpi slt, %34, %35 : vector<1x896xi32>
      %cst_16 = arith.constant 0.000000e+00 : f32
      %37 = vector.broadcast %cst_16 : f32 to vector<1x896xf32>
      %38 = arith.select %36, %19, %37 : vector<1x896xi1>, vector<1x896xf32>
      %c0_17 = arith.constant 0 : index
      %c0_18 = arith.constant 0 : index
      %39 = vector.load %arg6[%c0_17, %c0_18] : memref<1x896xf32, #tpu.memory_space<vmem>>, vector<1x896xf32>
      %40 = arith.addf %39, %38 : vector<1x896xf32>
      %c0_19 = arith.constant 0 : index
      %c0_20 = arith.constant 0 : index
      %41 = vector.load %arg6[%c0_19, %c0_20] : memref<1x896xf32, #tpu.memory_space<vmem>>, vector<1x896xf32>
      tpu.vector_store %arg6[%c0_19, %c0_20], %40 {strides = array<i32>} : memref<1x896xf32, #tpu.memory_space<vmem>>, vector<1x896xf32>,
    } else {
    }
    %c0_i32_12 = arith.constant 0 : i32
    %28 = arith.cmpi eq, %arg1, %c0_i32_12 : i32
    %29 = arith.extui %28 : i1 to i32
    %c0_i32_13 = arith.constant 0 : i32
    %30 = arith.cmpi ne, %29, %c0_i32_13 : i32
    scf.if %30 {
      %c0_14 = arith.constant 0 : index
      %c0_15 = arith.constant 0 : index
      %31 = vector.load %arg6[%c0_14, %c0_15] : memref<1x896xf32, #tpu.memory_space<vmem>>, vector<1x896xf32>
      %32 = vector.shape_cast %31 : vector<1x896xf32> to vector<1x1x896xf32>
      %cst_16 = arith.constant dense<0.000000e+00> : vector<1xf32>
      %33 = vector.multi_reduction <add>, %32, %cst_16 [1, 2] : vector<1x1x896xf32> to vector<1xf32>
      %34 = vector.shape_cast %33 : vector<1xf32> to vector<1x1x1xf32>
      %35 = vector.extract %34[0, 0, 0] : f32 from vector<1x1x1xf32>
      %cst_17 = arith.constant -0.0357142873 : f32
      %36 = arith.mulf %35, %cst_17 : f32
      %37 = vector.broadcast %36 : f32 to vector<1x128xf32>
      %c0_18 = arith.constant 0 : index
      %c0_19 = arith.constant 0 : index
      %38 = vector.load %arg5[%c0_18, %c0_19] : memref<1x128xf32, #tpu.memory_space<vmem>>, vector<1x128xf32>
      tpu.vector_store %arg5[%c0_18, %c0_19], %37 {strides = array<i32>} : memref<1x128xf32, #tpu.memory_space<vmem>>, vector<1x128xf32>,
    } else {
    }
    return
  }
  func.func @transform_0(%arg0: i32, %arg1: i32) -> (i32, i32) {
    %c0_i32 = arith.constant 0 : i32
    %c0_i32_0 = arith.constant 0 : i32
    %c0_i32_1 = arith.constant 0 : i32
    return %c0_i32, %c0_i32_0 : i32, i32
  }
  func.func @transform_1(%arg0: i32, %arg1: i32) -> (i32, i32) {
    %c1_i32 = arith.constant 1 : i32
    %0 = arith.muli %arg0, %c1_i32 : i32
    %1 = arith.addi %0, %arg1 : i32
    %c0_i32 = arith.constant 0 : i32
    %2 = arith.minsi %1, %c0_i32 : i32
    %c0_i32_0 = arith.constant 0 : i32
    %c0_i32_1 = arith.constant 0 : i32
    return %2, %c0_i32_0 : i32, i32
  }
  func.func @transform_2(%arg0: i32, %arg1: i32) -> (i32, i32) {
    %c1_i32 = arith.constant 1 : i32
    %0 = arith.muli %arg0, %c1_i32 : i32
    %1 = arith.addi %0, %arg1 : i32
    %c0_i32 = arith.constant 0 : i32
    %2 = arith.minsi %1, %c0_i32 : i32
    %c0_i32_0 = arith.constant 0 : i32
    %c0_i32_1 = arith.constant 0 : i32
    return %2, %c0_i32_0 : i32, i32
  }
  func.func @transform_3(%arg0: i32, %arg1: i32) -> (i32, i32) {
    %c0_i32 = arith.constant 0 : i32
    %c0_i32_0 = arith.constant 0 : i32
    return %c0_i32, %arg0 : i32, i32
  }
}

</mosaic_0001>

<bundles_post_ra>
// kernel: tpu_custom_call.1
= control target key start
LH: loop header
LB: loop body
LE: loop exit
PB: predicated region body
PF: predicated region fallthrough
CT: control target
= control target key end

     0   :  { %8 = vsyncpa [#allocation4], 0  ;;  %s1146_s0 = inlined_call_operand.hbm [shape: f32[1,896], index: 0, kind: input, shape index: {}]   ;;  %s1147_s1 = inlined_call_operand.hbm [shape: f32[1,896], index: 1, kind: input, shape index: {}]   ;;  %s1148_s2 = inlined_call_operand.vmem [shape: f32[1,896], index: 2, kind: input, shape index: {}]   ;;  %s1149_s3 = inlined_call_operand.hbm [shape: f32[1,256], index: 3, kind: output, shape index: {}]  }
   0x1   :  { %9 = vsyncpa [#allocation7], 0 }
   0x2   :  { %11 = vsyncpa [#allocation7 + $0x1], 0 }
   0x3   :  { %12 = vsyncpa [#allocation5], 0 }
   0x4   :  { %14 = vsyncpa [#allocation5 + $0x1], 0  ;;  %s907_s12 = smov 0   ;;  %s909_s13 = smov 0  }
   0x5   :  { %s911_s14 = smov 0   ;;  %s913_s15 = smov 0  }
   0x6   :  { %s915_s16 = smov 0   ;;  %s917_s17 = smov 0  }
   0x7   :  { %s919_s18 = smov 0   ;;  %s921_s19 = smov 0  }
   0x8 LB: > { %s590_s20 = sadd.s32 4294967295, %s880_s19   ;;  %s591_s21 = sadd.s32 4294967294, %s880_s19   ;;  %s880_s19 = sphi %s921_s19, %s20_s19   ;;  %s876_s18 = sphi %s919_s18, %s1179_s18   ;;  %s872_s17 = sphi %s917_s17, %s1178_s17   ;;  %s868_s16 = sphi %s915_s16, %s1136_s16   ;;  %s864_s15 = sphi %s913_s15, %s1177_s15   ;;  %s860_s14 = sphi %s911_s14, %s1176_s14   ;;  %s856_s13 = sphi %s909_s13, %s1175_s13   ;;  %s852_s12 = sphi %s907_s12, %s1174_s12  }
   0x9   : > { %p79_p0 = scmp.ne.s32.totalorder %s868_s16, %s864_s15  ;;  %p948_p1 = scmp.eq.s32.totalorder %s590_s20, 0 }
   0xa   : > { %s124_s23 = sadd.s32 1, %s860_s14  ;;  %p134_p2 = scmp.ne.s32.totalorder %s860_s14, %s856_s13 }
   0xb   : > { %s1156_s22 = scalar_select %p948_p1, 1, 0 }
   0xc   : > { %p957_p3 = por %p948_p1, %p79_p0  ;;  %p135_p4 = scmp.eq.s32.totalorder %s590_s20, 1 }
   0xd   : > { %p140_p5 = scmp.ne.s32.totalorder %s856_s13, %s852_s12  ;;  %p141_p6 = scmp.eq.s32.totalorder %s591_s21, 1 }
   0xe   : > { %s1157_s24 = scalar_select %p957_p3, 1, 0 }
   0xf   : > { %p963_p7 = por %p135_p4, %p134_p2  ;;  %p592_p8 = scmp.ge.s32.totalorder %s880_s19, 1 }
  0x10   : > { %p968_p9 = por %p141_p6, %p140_p5  ;;  %p148_p10 = scmp.lt.s32.totalorder %s880_s19, 3 }
  0x11   : > { %s1158_s25 = scalar_select %p963_p7, 1, 0 }
  0x12   : > { %s1159_s26 = scalar_select %p968_p9, 1, 0 }
  0x13   : > { %p973_p11 = pnand %p592_p8, %p148_p10  ;;  %s882_s28 = smov [#allocation3]  }
  0x14   : > { %s161_s29 = sshll.u32 %s882_s28, 4  ;;  %s32_s4 = sadd.s32 1, %s876_s18  ;;  %s162_s29 = int_to_ptr.vmem [resolvable:$true] %s161_s29 }
  0x15   : > { %s1160_s27 = scalar_select %p973_p11, 1, 0 }
  0x16   : > { %p620_p13 = pneg %p973_p11  ;;  %p987_p2 = scmp.ge.s32.totalorder %s32_s4, 2 }
  0x17   : > { %s715_s8 = scalar_lea.hbm %s1146_s0, 112 }
  0x18   : > { %p982_p0 = pnand %p620_p13, %p948_p1  ;;  %p716_p4 = scmp.ne.s32.totalorder %s1146_s0, %s715_s8 }
  0x19   : > { %s1162_s5 = scalar_select %p987_p2, 1, 0 }
  0x1a   : > { %p717_p5 = pneg %p982_p0  ;;  %p722_p10 = scmp.lt.u32.totalorder %s715_s8, %s1146_s0 }
  0x1c   : > { %p718_p6 = pnand %p717_p5, %p716_p4 }
  0x1e   : > { %p719_p8 = pneg %p718_p6 }
  0x20   : > { %p724_p13 = pnand %p722_p10, %p719_p8 }
  0x22   : > { %727 = shalt.err (!%p724_p13)
}
  0x23   : > { %s728_s20 = scalar_lea.vmem %s162_s29, 112  ;;  %s735_s21 = scalar_lea.vmem %s162_s29, 128 }
  0x24   : > { %p729_p12 = scmp.ne.s32.totalorder %s162_s29, %s728_s20  ;;  %p736_p3 = scmp.lt.s32.totalorder %s162_s29, %s162_s29 }
  0x25   : > { %p737_p1 = scmp.lt.s32.totalorder %s735_s21, %s728_s20 }
  0x26   : > { %p731_p9 = pnand %p729_p12, %p717_p5 }
  0x27   : > { %p738_p11 = por %p737_p1, %p736_p3 }
  0x28   : > { %p732_p7 = pneg %p731_p9 }
  0x2a   : > { %p739_p2 = pnand %p738_p11, %p732_p7 }
  0x2c   : > { %742 = shalt.err (!%p739_p2)
}
  0x2d   : > { %623 = dma.hbm_to_vmem [thread:$0]  (!%p982_p0), %s1146_s0, 112, %s162_s29, [#allocation4]  }
  0x2e   : > { %p1163_p9 = scmp.ne.s32.totalorder %s1162_s5, 0  ;;  %p849_p1 = scmp.ne.s32.totalorder %s868_s16, 0 }
  0x2f   : > { %p74_p3 = scmp.eq.s32.totalorder %s880_s19, 0  ;;  %p633_p12 = scmp.lt.s32.totalorder %s880_s19, 2 }
  0x30   : > { %s1181_s4 = smov (%p1163_p9, %s32_s4), 0  ;;  %s883_s9 = smov [#allocation6]  }
  0x31   : > { %p75_p7 = por %p849_p1, %p74_p3  ;;  %s121_s7 = ssub.s32 %s876_s18, %s1181_s4 }
  0x32   : > { %p122_p11 = scmp.eq.s32.totalorder %s121_s7, 0  ;;  %s187_s29 = sshll.u32 %s883_s9, 4  ;;  %s188_s29 = int_to_ptr.vmem [resolvable:$true] %s187_s29 }
  0x33   : > { %p1021_p2 = pnand %p633_p12, %p75_p7  ;;  %s743_s11 = scalar_lea.hbm %s1147_s1, 112 }
  0x34   : > { %s1019_s30 = scalar_select %p122_p11, %s860_s14, %s124_s23  }
  0x35   : > { %s1164_s8 = scalar_select %p1021_p2, 1, 0 }
  0x36   : > { %p744_p0 = scmp.ne.s32.totalorder %s1147_s1, %s743_s11  ;;  %p745_p4 = pneg %p1021_p2 }
  0x37   : > { %p750_p8 = scmp.lt.u32.totalorder %s743_s11, %s743_s11  ;;  %p752_p10 = scmp.lt.u32.totalorder %s743_s11, %s1147_s1 }
  0x38   : > { %p746_p5 = pnand %p745_p4, %p744_p0 }
  0x39   : > { %p753_p13 = por %p752_p10, %p750_p8 }
  0x3a   : > { %p747_p6 = pneg %p746_p5 }
  0x3c   : > { %p754_p9 = pnand %p753_p13, %p747_p6 }
  0x3e   : > { %757 = shalt.err (!%p754_p9)
}
  0x3f   : > { %s758_s28 = scalar_lea.vmem %s188_s29, 112  ;;  %s765_s6 = scalar_lea.vmem %s188_s29, 224 }
  0x40   : > { %p759_p1 = scmp.ne.s32.totalorder %s188_s29, %s758_s28  ;;  %p766_p11 = scmp.lt.s32.totalorder %s188_s29, %s188_s29 }
  0x41   : > { %p767_p12 = scmp.lt.s32.totalorder %s765_s6, %s758_s28 }
  0x42   : > { %p761_p3 = pnand %p759_p1, %p745_p4 }
  0x43   : > { %p768_p2 = por %p767_p12, %p766_p11 }
  0x44   : > { %p762_p7 = pneg %p761_p3 }
  0x46   : > { %p769_p0 = pnand %p768_p2, %p762_p7 }
  0x48   : > { %772 = shalt.err (!%p769_p0)
}
  0x49   : > { %p1165_p5 = scmp.ne.s32.totalorder %s1164_s8, 0  ;;  %p1166_p8 = scmp.ne.s32.totalorder %s1160_s27, 0 }
  0x4a   : > { %p1167_p6 = scmp.ne.s32.totalorder (!%p1166_p8), %s1156_s22, 0 }
  0x4b   : > { %627 = dma.hbm_to_vmem [thread:$0]  (!%p1165_p5), %s1147_s1, 112, %s188_s29, [#allocation7]  }
  0x4c   : > { %209 = sbr.rel (%p1166_p8) target bundleno = 383 (0x17f), region = 32 }
  0x53   : > { %838 = dma.done.wait (%p1167_p6), [#allocation4], 112  }
  0x54   : > { %840 = vsyncadd (%p1167_p6), [#allocation4], 4294967184  ;;  %s215_s5 = sand.u32 1, %s868_s16   ;;  %p1168_p2 = scmp.ne.s32.totalorder %s1157_s24, 0 }
  0x55   : > { %s608_s10 = smul.u32 7, %s215_s5  ;;  %s216_s11 = scalar_lea.sflag [#allocation7], %s215_s5 }
  0x57   : > { %s219_s15 = scalar_lea.vmem [#allocation6], %s608_s10 }
  0x58   : > { %842 = dma.done.wait (%p1168_p2), %s216_s11, 112  }
  0x59   : > { %844 = vsyncadd (%p1168_p2), %s216_s11, 4294967184  ;;  %s246_s27 = sand.u32 1, %s856_s13   ;;  %v265_v0 = vlaneseq  ;;  %p252_p4 = scmp.lt.s32.totalorder %s872_s17, 0  ;;  %v884_v2 = vmov 0.0   ;;  %v270_v3 = vld [vmem:[%s219_s15] sm:$0xff]  ;;  %v272_v9 = vld [vmem:[#allocation3] sm:$0xff] }
  0x5a   : > { %711 = vlog2.f32 %v270_v3  ;;  %v276_v4 = vsub.f32 1.0, %v270_v3  ;;  %s1067_s23 = scalar_lea.vmem [#allocation8], %s246_s27  ;;  %p601_p10 = scmp.ge.s32.totalorder %s872_s17, 1 }
  0x5b   : > { %vm1055_vm0 = vcmp.lt.s32.totalorder %v265_v0, 896  ;;  %s253_s22 = scalar_select %p252_p4, %s872_s17, 0 }
  0x5c   : > { %269 = vst.msk [vmem:[#allocation2] sm:$0x7f] %vm1055_vm0, %v884_v2  ;;  %713 = vlog2.f32 %v276_v4 }
  0x5d   : > { %s1183_s22 = smov (!%p252_p4, %s253_s22), 0 }
  0x5e   : > { %s609_s24 = smul.u32 7, %s1183_s22 }
  0x60   : > { %s257_s20 = scalar_lea.vmem %s1148_s2, %s609_s24 }
  0x61   : > { %v271_v8 = vld [vmem:[%s257_s20] sm:$0xff] }
  0x62   : > { %v283_v13 = vsub.f32 %v271_v8, %v272_v9 }
  0x63   : > { %v291_v19 = vld [vmem:[#allocation2] sm:$0xff] (!%p601_p10) }
  0x64   : > { %v712_v5 = vpop.eup %711  ;;  %v284_v16 = vand.u32 2147483647, %v283_v13 }
  0x65   : > { %v274_v6 = vmul.f32 0.6931472, %v712_v5 }
  0x66   : > { %v714_v7 = vpop.eup %713 }
  0x67   : > { %v275_v10 = vmax.f32 %v274_v6, -100.0  ;;  %v278_v11 = vmul.f32 0.6931472, %v714_v7 }
  0x69   : > { %v279_v12 = vmax.f32 %v278_v11, -100.0 }
  0x6b   : > { %v280_v14 = vsub.f32 %v275_v10, %v279_v12  ;;  %290 = sbr.rel (%p601_p10) target bundleno = 118 (0x76), region = 48 }
  0x6d   : > { %v281_v15 = vmul.f32 %v280_v14, %v271_v8 }
  0x6f   : > { %v282_v17 = vadd.f32 %v281_v15, %v279_v12 }
  0x71   : > { %v285_v18 = vmul.f32 %v284_v16, %v282_v17 }
  0x73   : > { %v292_v20 = vadd.f32 %v291_v19, %v285_v18 }
  0x75   : > { %297 = vst.msk [vmem:[#allocation2] sm:$0x7f] %vm1055_vm0, %v292_v20 }
  0x76 PF: > { %p602_p13 = scmp.lt.s32.totalorder %s872_s17, 1 }
  0x77   : > { %v303_v21 = vshrl.u32 (!%p602_p13), %v265_v0, 7  ;;  %v304_v22 = vstv (!%p602_p13), %s872_s17  ;;  %v885_v23 = vmov (!%p602_p13), 1966171168  }
  0x78   : > { %301 = sbr.rel (%p602_p13) target bundleno = 140 (0x8c), region = 52  ;;  %v362_v24 = vunpack.c.l.s4 (!%p602_p13), %v885_v23 }
  0x79   : > { %v305_v25 = vadd.s32 (!%p602_p13), %v304_v22, %v303_v21  ;;  %v310_v26 = vsub.s32 (!%p602_p13), 0, %v303_v21  ;;  %v314_v27 = vsub.s32 (!%p602_p13), 1, %v303_v21  ;;  %v318_v28 = vsub.s32 (!%p602_p13), 2, %v303_v21 }
  0x7a   : > { %v322_v29 = vsub.s32 (!%p602_p13), 3, %v303_v21  ;;  %v326_v30 = vsub.s32 (!%p602_p13), 4, %v303_v21  ;;  %v330_v31 = vsub.s32 (!%p602_p13), 5, %v303_v21  ;;  %v334_v32 = vsub.s32 (!%p602_p13), 6, %v303_v21 }
  0x7b   : > { %vm306_vm1 = vcmp.lt.s32.totalorder (!%p602_p13), %v305_v25, 1  ;;  %v311_v33 = vrot.slane (!%p602_p13), %v285_v18, %v310_v26  ;;  %v315_v34 = vrot.slane (!%p602_p13), %v285_v18, %v314_v27  ;;  %v319_v35 = vrot.slane (!%p602_p13), %v285_v18, %v318_v28 }
  0x7c   : > { %v323_v36 = vrot.slane (!%p602_p13), %v285_v18, %v322_v29  ;;  %v327_v37 = vrot.slane (!%p602_p13), %v285_v18, %v326_v30  ;;  %v331_v38 = vrot.slane (!%p602_p13), %v285_v18, %v330_v31  ;;  %v335_v39 = vrot.slane (!%p602_p13), %v285_v18, %v334_v32  ;;  %v350_v60 = vld [vmem:[#allocation2] sm:$0xff] (!%p602_p13) }
  0x7d   : > { %v343_v40 = vsel (!%p602_p13), %vm306_vm1, %v311_v33, 0.0  ;;  %v344_v41 = vsel (!%p602_p13), %vm306_vm1, %v315_v34, 0.0  ;;  %v345_v42 = vsel (!%p602_p13), %vm306_vm1, %v319_v35, 0.0  ;;  %v363_v43 = vunpack.c.0.s8 (!%p602_p13), %v362_v24 }
  0x7e   : > { %v346_v44 = vsel (!%p602_p13), %vm306_vm1, %v323_v36, 0.0  ;;  %v347_v45 = vsel (!%p602_p13), %vm306_vm1, %v327_v37, 0.0  ;;  %v348_v46 = vsel (!%p602_p13), %vm306_vm1, %v331_v38, 0.0  ;;  %v349_v47 = vsel (!%p602_p13), %vm306_vm1, %v335_v39, 0.0 }
  0x7f   : > { %v358_v48 = vcombine.low %v343_v40, %v344_v41  ;;  %v359_v49 = vcombine.low %v345_v42, %v346_v44  ;;  %v360_v50 = vcombine.low %v347_v45, %v348_v46  ;;  %v366_v51 = vsub.s32 %v363_v43, %v303_v21 }
  0x81   : > { %v367_v52 = vrot.slane %v358_v48, %v366_v51  ;;  %v374_v53 = vrot.slane %v359_v49, %v366_v51  ;;  %v381_v54 = vrot.slane %v360_v50, %v366_v51  ;;  %v388_v55 = vrot.slane %v349_v47, %v366_v51 }
  0x83   : > { %v389_v56 = vcombine.low %v367_v52, %v374_v53  ;;  %v390_v57 = vcombine.low %v381_v54, %v388_v55 }
  0x85   : > { %v397_v58 = vrot.slane %v389_v56, %v366_v51  ;;  %v404_v59 = vrot.slane %v390_v57, %v366_v51 }
  0x87   : > { %v405_v61 = vcombine.low %v397_v58, %v404_v59 }
  0x89   : > { %v407_v62 = vadd.f32 %v405_v61, %v350_v60 }
  0x8b   : > { %412 = vst.msk [vmem:[#allocation2] sm:$0x7f] %vm1055_vm0, %v407_v62 }
  0x8c PF: > { %v419_v63 = vshrl.u32 %v265_v0, 7  ;;  %vm453_vm2 = vcmask 1040384   ;;  %s603_s21 = sshll.u32 %s872_s17, 4  ;;  %s492_s28 = sshll.u32 %s1067_s23, 4  ;;  %s1092_s28 = int_to_ptr.vmem [resolvable:$true] %s492_s28 }
  0x8d   : > { %s1090_s10 = scalar_lea.hbm %s1149_s3, %s603_s21  ;;  %s480_s11 = scalar_lea.sflag [#allocation5], %s246_s27 }
  0x8e   : > { %v420_v3 = vsub.s32 0, %v419_v63  ;;  %v424_v4 = vsub.s32 1, %v419_v63  ;;  %v428_v5 = vsub.s32 2, %v419_v63  ;;  %v432_v6 = vsub.s32 3, %v419_v63  ;;  %s773_s15 = scalar_lea.vmem %s1092_s28, 16  ;;  %p1171_p1 = scmp.ne.s32.totalorder %s1158_s25, 0 }
  0x8f   : > { %v436_v7 = vsub.s32 4, %v419_v63  ;;  %v440_v8 = vsub.s32 5, %v419_v63  ;;  %v444_v13 = vsub.s32 6, %v419_v63  ;;  %p774_p9 = scmp.ne.s32.totalorder %s1092_s28, %s773_s15  ;;  %s886_s17 = smov [#allocation8]  }
  0x90   : > { %s777_s22 = sshll.u32 %s886_s17, 4  ;;  %s778_s22 = int_to_ptr.vmem [resolvable:$false] %s777_s22 }
  0x91   : > { %p775_p3 = pnand %p774_p9, %p1171_p1  ;;  %s779_s24 = scalar_lea.vmem %s778_s22, 32 }
  0x92   : > { %v416_v2 = vld [vmem:[#allocation2] sm:$0xff]  ;;  %p780_p11 = scmp.lt.s32.totalorder %s1092_s28, %s778_s22  ;;  %p781_p12 = scmp.lt.s32.totalorder %s779_s24, %s773_s15 }
  0x93   : > { %v421_v9 = vrot.slane %v416_v2, %v420_v3  ;;  %v425_v10 = vrot.slane %v416_v2, %v424_v4  ;;  %v429_v11 = vrot.slane %v416_v2, %v428_v5  ;;  %v433_v12 = vrot.slane %v416_v2, %v432_v6  ;;  %p776_p7 = pneg %p775_p3 }
  0x94   : > { %v437_v14 = vrot.slane %v416_v2, %v436_v7  ;;  %v441_v17 = vrot.slane %v416_v2, %v440_v8  ;;  %v445_v20 = vrot.slane %v416_v2, %v444_v13  ;;  %p782_p0 = por %p781_p12, %p780_p11 }
  0x95   : > { %v454_v1 = vsel %vm453_vm2, %v421_v9, 0.0  ;;  %v455_v15 = vsel %vm453_vm2, %v425_v10, 0.0  ;;  %v457_v0 = vsel %vm453_vm2, %v429_v11, 0.0  ;;  %v459_v18 = vsel %vm453_vm2, %v433_v12, 0.0 }
  0x96   : > { %v456_v16 = vadd.f32 %v455_v15, %v454_v1  ;;  %v461_v21 = vsel %vm453_vm2, %v437_v14, 0.0  ;;  %v463_v23 = vsel %vm453_vm2, %v441_v17, 0.0  ;;  %v465_v25 = vsel %vm453_vm2, %v445_v20, 0.0  ;;  %p783_p5 = pnand %p782_p0, %p776_p7 }
  0x98   : > { %v458_v19 = vadd.f32 %v457_v0, %v456_v16 }
  0x9a   : > { %v460_v22 = vadd.f32 %v459_v18, %v458_v19 }
  0x9c   : > { %v462_v24 = vadd.f32 %v461_v21, %v460_v22 }
  0x9e   : > { %v464_v26 = vadd.f32 %v463_v23, %v462_v24 }
  0xa0   : > { %v466_v27 = vadd.f32 %v465_v25, %v464_v26 }
  0xa2   : > { %467 = vadd.xlane.f32.xlu0 %v466_v27 }
 0x12f   : > { %v468_v28 = vpop.xlane.xlu0 %467 }
 0x130   : > { %v469_v29 = vrot.slane %v468_v28, 4 }
 0x132   : > { %v470_v30 = vadd.f32 %v469_v29, %v468_v28 }
 0x134   : > { %v471_v31 = vrot.slane %v470_v30, 2 }
 0x136   : > { %v472_v32 = vadd.f32 %v471_v31, %v470_v30 }
 0x138   : > { %v473_v33 = vrot.slane %v472_v32, 1 }
 0x13a   : > { %v474_v34 = vadd.f32 %v473_v33, %v472_v32 }
 0x13c   : > { %610 = vpush %v474_v34 }
 0x16d   : > { %s611_s6 = spop %610 }
 0x16e   : > { %s476_s7 = smul.f32 -0.035714287, %s611_s6 }
 0x170   : > { %v477_v35 = vstv %s476_s7 }
 0x171   : > { %478 = vst [vmem:[%s1067_s23] sm:$0x1] %v477_v35 }
 0x172   : > { %786 = shalt.err (!%p783_p5)
}
 0x173   : > { %s787_s27 = scalar_lea.hbm %s1090_s10, 16  ;;  %s791_s20 = scalar_lea.hbm %s1149_s3, 32 }
 0x174   : > { %p788_p8 = scmp.ne.s32.totalorder %s1090_s10, %s787_s27  ;;  %p792_p4 = scmp.lt.u32.totalorder %s1090_s10, %s1149_s3 }
 0x175   : > { %p793_p10 = scmp.lt.u32.totalorder %s791_s20, %s787_s27  ;;  %p795_p9 = scmp.lt.u32.totalorder %s787_s27, %s1090_s10 }
 0x176   : > { %p789_p6 = pnand %p788_p8, %p1171_p1 }
 0x177   : > { %p794_p13 = por %p793_p10, %p792_p4 }
 0x178   : > { %p790_p2 = pneg %p789_p6 }
 0x179   : > { %p796_p3 = por %p795_p9, %p794_p13 }
 0x17b   : > { %p797_p7 = pnand %p796_p3, %p790_p2 }
 0x17d   : > { %800 = shalt.err (!%p797_p7)
}
 0x17e   : > { %618 = dma.vmem_to_hbm [thread:$0]  (%p1171_p1), %s1092_s28, 16, %s1090_s10, %s480_s11  }
 0x17f PF: > { %s504_s6 = sand.u32 1, %s852_s12   ;;  %p1172_p11 = scmp.ne.s32.totalorder %s1159_s26, 0 }
 0x180   : > { %p1173_p12 = scmp.ge.s32.totalorder %s880_s19, 2  ;;  %s505_s7 = scalar_lea.sflag [#allocation5], %s504_s6 }
 0x182   : > { %p629_p0 = pnand %p1173_p12, %p1172_p11 }
 0x184   : > { %846 = dma.done.wait (!%p629_p0), %s505_s7, 16  }
 0x185   : > { %848 = vsyncadd (!%p629_p0), %s505_s7, 4294967280  ;;  %s20_s19 = sadd.s32 1, %s880_s19   ;;  %s1174_s12 = smov %s856_s13 }
 0x186   : > { %p17_p5 = scmp.ge.s32.totalorder %s20_s19, 4   ;;  %s1175_s13 = smov %s860_s14 }
 0x187   : > { %s1176_s14 = smov %s1019_s30  ;;  %s1177_s15 = smov %s868_s16 }
 0x188   : > { %s1136_s16 = smov 0   ;;  %s1178_s17 = smov %s876_s18 }
 0x189   : > { %s1179_s18 = smov %s1181_s4  ;;  %19 = sbr.rel (!%p17_p5) target bundleno = 8 (0x8), region = 101 }
 0x190   :  { %509 = vsyncpa [#allocation4], 1 }
 0x191   :  { %511 = vsyncpa [#allocation4 + $0x1], 1 }
 0x192   :  { %512 = vsyncpa [#allocation7], 1 }
 0x193   :  { %514 = vsyncpa [#allocation7 + $0x1], 1 }
 0x194   :  { %515 = vsyncpa [#allocation5], 1 }
 0x195   :  { %517 = vsyncpa [#allocation5 + $0x1], 1 }

</bundles_post_ra>
